<compile_context>
chip_gen: v6e
topology: v6e:2x2x1
jax: 0.10.0
libtpu: 0.0.40
codegen_flags: <defaults>
</compile_context>

<pallas_src>
import functools

import jax
import jax.numpy as jnp
from jax import lax
from jax.experimental import pallas as pl
from jax.experimental.pallas import tpu as pltpu
import numpy as np


# ---------------------------------------------------------------------------
# Pooling-matrix construction (host side, numpy).
# ---------------------------------------------------------------------------

def _out_dim(size_in, kernel_size, stride):
    return (size_in - kernel_size) // stride + 1


def _pool_matrix_1d(size_in, kernel_size, stride):
    """P[i, j] = 1 if input position i lies in output window j (no padding)."""
    size_out = _out_dim(size_in, kernel_size, stride)
    i = np.arange(size_in)[:, None]
    j = np.arange(size_out)[None, :]
    return ((i >= j * stride) & (i < j * stride + kernel_size)).astype(np.float64)


def _pool_matrix_2d(h, w, kernel_size, stride, dtype, fold_scale):
    """kron(Ph, Pw): (H*W, H_out*W_out).  Optionally folds the 1/k^2 scale."""
    p = np.kron(_pool_matrix_1d(h, kernel_size, stride),
                _pool_matrix_1d(w, kernel_size, stride))
    if fold_scale:
        p = p / float(kernel_size * kernel_size)
    return jnp.asarray(p, dtype=dtype)


def _scale_plan(kernel_size):
    """Fold 1/k^2 into the pooling matrix only when it is exact (power of 2)."""
    k2 = kernel_size * kernel_size
    fold = (k2 & (k2 - 1)) == 0
    return fold, (None if fold else 1.0 / k2)


# ---------------------------------------------------------------------------
# Kernel bodies.
# ---------------------------------------------------------------------------

def _pool_block(x, p, post_scale):
    """(C_blk, H*W) @ (H*W, Ho*Wo) -> f32 (C_blk, Ho*Wo) on the MXU."""
    acc = jnp.dot(x, p, preferred_element_type=jnp.float32)
    if post_scale is not None:
        acc = acc * jnp.float32(post_scale)
    return acc


def _avgpool_kernel(post_scale, x_ref, p_ref, o_ref):
    # x_ref: (1, C_blk, H*W), p_ref: (H*W, Ho*Wo), o_ref: (1, C_blk, Ho*Wo)
    o_ref[0] = _pool_block(x_ref[0], p_ref[...], post_scale).astype(o_ref.dtype)


def _oct_fused_kernel(post_scale, xh_ref, xl_ref, ph_ref, plo_ref,
                      oh_ref, ol_ref):
    # Both OctConv branches handled in one grid step (one launch total).
    oh_ref[0] = _pool_block(xh_ref[0], ph_ref[...], post_scale).astype(oh_ref.dtype)
    ol_ref[0] = _pool_block(xl_ref[0], plo_ref[...], post_scale).astype(ol_ref.dtype)


# ---------------------------------------------------------------------------
# Block sizing / VMEM budgeting.
# ---------------------------------------------------------------------------

# Keep one input block around ~8 MiB so that double-buffered in + out blocks
# plus the resident pooling matrix stay well under v7x's 64 MiB VMEM per TC.
_TARGET_IN_BLOCK_BYTES = 8 * 1024 * 1024
_FUSED_VMEM_BUDGET = 40 * 1024 * 1024


def _choose_c_block(c, hw_elems, itemsize):
    per_channel = max(1, hw_elems * itemsize)
    max_c = max(1, _TARGET_IN_BLOCK_BYTES // per_channel)
    if c <= max_c:
        return c                        # whole channel dim in one block
    return max(8, (max_c // 8) * 8)     # multiple of 8 for the (8, 128) rule


def _vmem_limit(block_bytes):
    # 2x margin for pipelining + compiler scratch; clamp to v7x physical VMEM.
    return int(min(max(2 * block_bytes, 32 << 20), 64 << 20))


# ---------------------------------------------------------------------------
# Pallas wrappers.
# ---------------------------------------------------------------------------

def avg_pool2d_pallas(x, kernel_size, stride):
    """F.avg_pool2d(x, kernel_size, stride) for NCHW input, no padding."""
    n, c, h, w = x.shape
    h_out = _out_dim(h, kernel_size, stride)
    w_out = _out_dim(w, kernel_size, stride)
    hw, how = h * w, h_out * w_out
    fold, post_scale = _scale_plan(kernel_size)
    p2d = _pool_matrix_2d(h, w, kernel_size, stride, x.dtype, fold)

    itemsize = x.dtype.itemsize
    c_blk = _choose_c_block(c, hw, itemsize)
    c_tiles = pl.cdiv(c, c_blk)
    block_bytes = (2 * c_blk * (hw + how) * itemsize
                   + 2 * p2d.size * p2d.dtype.itemsize)

    x2 = x.reshape(n, c, hw)            # free reshape; lane-dense last dim
    kernel = functools.partial(_avgpool_kernel, post_scale)
    y = pl.pallas_call(
        kernel,
        out_shape=jax.ShapeDtypeStruct((n, c, how), x.dtype),
        grid=(n, c_tiles),
        in_specs=[
            pl.BlockSpec((1, c_blk, hw), lambda i, j: (i, j, 0)),
            # Constant index map -> pooling matrix is DMA'd once and stays
            # resident across the whole grid.
            pl.BlockSpec((hw, how), lambda i, j: (0, 0)),
        ],
        out_specs=pl.BlockSpec((1, c_blk, how), lambda i, j: (i, j, 0)),
        compiler_params=pltpu.CompilerParams(
            dimension_semantics=("parallel", "parallel"),
            vmem_limit_bytes=_vmem_limit(block_bytes)),
    )(x2, p2d)
    return y.reshape(n, c, h_out, w_out)


def _oct_pool_fused(xh, xl, kernel_size, stride):
    """Both OctConv branches in ONE pallas_call (grid over the batch)."""
    n, ch, hh, wh = xh.shape
    _, cl, hl, wl = xl.shape
    hho, who = _out_dim(hh, kernel_size, stride), _out_dim(wh, kernel_size, stride)
    hlo, wlo = _out_dim(hl, kernel_size, stride), _out_dim(wl, kernel_size, stride)
    fold, post_scale = _scale_plan(kernel_size)
    p_h = _pool_matrix_2d(hh, wh, kernel_size, stride, xh.dtype, fold)
    p_l = _pool_matrix_2d(hl, wl, kernel_size, stride, xl.dtype, fold)

    hw_h, how_h = hh * wh, hho * who
    hw_l, how_l = hl * wl, hlo * wlo
    block_bytes = (2 * ch * (hw_h + how_h) * xh.dtype.itemsize
                   + 2 * cl * (hw_l + how_l) * xl.dtype.itemsize
                   + 2 * p_h.size * p_h.dtype.itemsize
                   + 2 * p_l.size * p_l.dtype.itemsize)

    kernel = functools.partial(_oct_fused_kernel, post_scale)
    yh, yl = pl.pallas_call(
        kernel,
        out_shape=(jax.ShapeDtypeStruct((n, ch, how_h), xh.dtype),
                   jax.ShapeDtypeStruct((n, cl, how_l), xl.dtype)),
        grid=(n,),
        in_specs=[
            pl.BlockSpec((1, ch, hw_h), lambda i: (i, 0, 0)),
            pl.BlockSpec((1, cl, hw_l), lambda i: (i, 0, 0)),
            pl.BlockSpec((hw_h, how_h), lambda i: (0, 0)),
            pl.BlockSpec((hw_l, how_l), lambda i: (0, 0)),
        ],
        out_specs=(
            pl.BlockSpec((1, ch, how_h), lambda i: (i, 0, 0)),
            pl.BlockSpec((1, cl, how_l), lambda i: (i, 0, 0)),
        ),
        compiler_params=pltpu.CompilerParams(
            dimension_semantics=("parallel",),
            vmem_limit_bytes=_vmem_limit(block_bytes)),
    )(xh.reshape(n, ch, hw_h), xl.reshape(n, cl, hw_l), p_h, p_l)
    return yh.reshape(n, ch, hho, who), yl.reshape(n, cl, hlo, wlo)


def oct_avg_pool2d_pallas(xh, xl, kernel_size, stride):
    """Pool both OctConv branches; fuse into one launch when they fit VMEM."""
    def branch_bytes(t):
        _, c, h, w = t.shape
        ho = _out_dim(h, kernel_size, stride)
        wo = _out_dim(w, kernel_size, stride)
        return (2 * c * (h * w + ho * wo) * t.dtype.itemsize
                + (h * w) * (ho * wo) * t.dtype.itemsize)

    if (xh.shape[0] == xl.shape[0]
            and branch_bytes(xh) + branch_bytes(xl) <= _FUSED_VMEM_BUDGET):
        return _oct_pool_fused(xh, xl, kernel_size, stride)
    # Large shapes: two channel-tiled launches, traced under the same jit so
    # XLA can still pipeline them.
    return (avg_pool2d_pallas(xh, kernel_size, stride),
            avg_pool2d_pallas(xl, kernel_size, stride))


class AvgPool2dOctConv2d:
    """JAX/Pallas port of AvgPool2d_OctConv2d (no learnable parameters).

    Calling convention matches the PyTorch module: a (x_high, x_low) tuple
    when both frequency branches exist, a plain NCHW tensor otherwise.
    """

    def __init__(self, channels, kernel_size, stride, alpha=0.5):
        assert 0 <= alpha <= 1, "Alpha must be in interval [0, 1]"
        self.ch_l = int(alpha * channels)
        self.ch_h = channels - self.ch_l
        self.kernel_size = kernel_size
        self.stride = stride
        ks, st = kernel_size, stride
        self._pool_one = jax.jit(lambda x: avg_pool2d_pallas(x, ks, st))
        self._pool_two = jax.jit(lambda a, b: oct_avg_pool2d_pallas(a, b, ks, st))

    def __call__(self, x):
        if self.ch_h == 0 or self.ch_l == 0:
            return self._pool_one(x)
        xh, xl = x
        return self._pool_two(xh, xl)


# ---------------------------------------------------------------------------
# Pure-JAX reference + self-test.
# ---------------------------------------------------------------------------

def _avg_pool2d_ref(x, kernel_size, stride):
    """Matches F.avg_pool2d (padding=0); computed in f32."""
    summed = lax.reduce_window(
        x.astype(jnp.float32), 0.0, lax.add,
        window_dimensions=(1, 1, kernel_size, kernel_size),
        window_strides=(1, 1, stride, stride),
        padding="VALID")
    return summed / float(kernel_size * kernel_size)


if __name__ == "__main__":
    key = jax.random.PRNGKey(0)
    k1, k2, k3 = jax.random.split(key, 3)

    channels, kernel_size, stride = 4, 2, 2
    batch, H = 2, 16

    # OctConv convention: high-freq at full resolution, low-freq at half.
    xh = jax.random.normal(k1, (batch, 2, H, H), dtype=jnp.float32)
    xl = jax.random.normal(k2, (batch, 2, H // 2, H // 2), dtype=jnp.float32)

    mod = AvgPool2dOctConv2d(channels, kernel_size, stride, alpha=0.5)
    yh, yl = jax.block_until_ready(mod((xh, xl)))

    yh_ref = _avg_pool2d_ref(xh, kernel_size, stride)
    yl_ref = _avg_pool2d_ref(xl, kernel_size, stride)
    assert yh.shape == (batch, 2, H // 2, H // 2)
    assert yl.shape == (batch, 2, H // 4, H // 4)
    np.testing.assert_allclose(np.asarray(yh), np.asarray(yh_ref),
                               rtol=1e-5, atol=1e-5)
    np.testing.assert_allclose(np.asarray(yl), np.asarray(yl_ref),
                               rtol=1e-5, atol=1e-5)

    # Single-tensor path (alpha=0 -> ch_l=0), channel-tiled kernel.
    mod_single = AvgPool2dOctConv2d(channels, kernel_size, stride, alpha=0.0)
    y_single = jax.block_until_ready(mod_single(xh))
    np.testing.assert_allclose(np.asarray(y_single), np.asarray(yh_ref),
                               rtol=1e-5, atol=1e-5)

    # bf16 input stays bf16 on the MXU (f32 accumulation); looser tolerance
    # only because the final bf16 output cast quantizes to ~3 digits.
    xh_bf16 = xh.astype(jnp.bfloat16)
    y_bf16 = jax.block_until_ready(mod_single(xh_bf16))
    ref_bf16 = _avg_pool2d_ref(xh_bf16, kernel_size, stride)
    np.testing.assert_allclose(np.asarray(y_bf16, dtype=np.float32),
                               np.asarray(ref_bf16), rtol=2e-2, atol=2e-2)

    # Non-power-of-two window: 1/k^2 applied post-matmul (exactness path).
    x9 = jax.random.normal(k3, (batch, channels, 12, 12), dtype=jnp.float32)
    mod9 = AvgPool2dOctConv2d(channels, kernel_size=3, stride=3, alpha=1.0)
    y9 = jax.block_until_ready(mod9(x9))
    y9_ref = _avg_pool2d_ref(x9, 3, 3)
    np.testing.assert_allclose(np.asarray(y9), np.asarray(y9_ref),
                               rtol=1e-5, atol=1e-5)

    print("KERNEL_OK")
</pallas_src>

<mosaic_0001>
module attributes {stable_mosaic.version = 11 : i64} {
  func.func @_oct_fused_kernel(%arg0: i32, %arg1: memref<1x2x256xf32, #tpu.memory_space<vmem>>, %arg2: memref<1x2x64xf32, #tpu.memory_space<vmem>>, %arg3: memref<256x64xf32, #tpu.memory_space<vmem>>, %arg4: memref<64x16xf32, #tpu.memory_space<vmem>>, %arg5: memref<1x2x64xf32, #tpu.memory_space<vmem>>, %arg6: memref<1x2x16xf32, #tpu.memory_space<vmem>>) attributes {dimension_semantics = [#tpu.dimension_semantics<parallel>], iteration_bounds = array<i64: 2>, scalar_prefetch = 0 : i64, scratch_operands = 0 : i64, tpu.core_type = #tpu.core_type<tc>, window_params = [{transform_indices = @transform_0, window_bounds = array<i64: 1, 2, 256>}, {transform_indices = @transform_1, window_bounds = array<i64: 1, 2, 64>}, {pipeline_mode = #tpu.pipeline_mode<synchronous>, transform_indices = @transform_2, window_bounds = array<i64: 256, 64>}, {pipeline_mode = #tpu.pipeline_mode<synchronous>, transform_indices = @transform_3, window_bounds = array<i64: 64, 16>}, {transform_indices = @transform_4, window_bounds = array<i64: 1, 2, 64>}, {transform_indices = @transform_5, window_bounds = array<i64: 1, 2, 16>}]} {
    %c0 = arith.constant 0 : index
    %c0_0 = arith.constant 0 : index
    %c0_1 = arith.constant 0 : index
    %0 = vector.load %arg1[%c0, %c0_0, %c0_1] : memref<1x2x256xf32, #tpu.memory_space<vmem>>, vector<1x2x256xf32>
    %1 = vector.shape_cast %0 : vector<1x2x256xf32> to vector<2x256xf32>
    %c0_2 = arith.constant 0 : index
    %c0_3 = arith.constant 0 : index
    %2 = vector.load %arg3[%c0_2, %c0_3] : memref<256x64xf32, #tpu.memory_space<vmem>>, vector<256x64xf32>
    %cst = arith.constant dense<0.000000e+00> : vector<2x64xf32>
    %3 = tpu.matmul %1, %2, %cst {dimension_numbers = #tpu.dot_dimension_numbers<[1], [0], [0], [1], [0, 0, 1, 1], [], []>} : vector<2x256xf32>, vector<256x64xf32>, vector<2x64xf32> -> vector<2x64xf32>
    %c0_4 = arith.constant 0 : index
    %c0_5 = arith.constant 0 : index
    %c0_6 = arith.constant 0 : index
    %4 = vector.load %arg5[%c0_4, %c0_5, %c0_6] : memref<1x2x64xf32, #tpu.memory_space<vmem>>, vector<1x2x64xf32>
    %5 = vector.shape_cast %4 : vector<1x2x64xf32> to vector<2x64xf32>
    %6 = vector.shape_cast %3 : vector<2x64xf32> to vector<1x2x64xf32>
    tpu.vector_store %arg5[%c0_4, %c0_5, %c0_6], %6 {strides = array<i32>} : memref<1x2x64xf32, #tpu.memory_space<vmem>>, vector<1x2x64xf32>,
    %c0_7 = arith.constant 0 : index
    %c0_8 = arith.constant 0 : index
    %c0_9 = arith.constant 0 : index
    %7 = vector.load %arg2[%c0_7, %c0_8, %c0_9] : memref<1x2x64xf32, #tpu.memory_space<vmem>>, vector<1x2x64xf32>
    %8 = vector.shape_cast %7 : vector<1x2x64xf32> to vector<2x64xf32>
    %c0_10 = arith.constant 0 : index
    %c0_11 = arith.constant 0 : index
    %9 = vector.load %arg4[%c0_10, %c0_11] : memref<64x16xf32, #tpu.memory_space<vmem>>, vector<64x16xf32>
    %cst_12 = arith.constant dense<0.000000e+00> : vector<2x16xf32>
    %10 = tpu.matmul %8, %9, %cst_12 {dimension_numbers = #tpu.dot_dimension_numbers<[1], [0], [0], [1], [0, 0, 1, 1], [], []>} : vector<2x64xf32>, vector<64x16xf32>, vector<2x16xf32> -> vector<2x16xf32>
    %c0_13 = arith.constant 0 : index
    %c0_14 = arith.constant 0 : index
    %c0_15 = arith.constant 0 : index
    %11 = vector.load %arg6[%c0_13, %c0_14, %c0_15] : memref<1x2x16xf32, #tpu.memory_space<vmem>>, vector<1x2x16xf32>
    %12 = vector.shape_cast %11 : vector<1x2x16xf32> to vector<2x16xf32>
    %13 = vector.shape_cast %10 : vector<2x16xf32> to vector<1x2x16xf32>
    tpu.vector_store %arg6[%c0_13, %c0_14, %c0_15], %13 {strides = array<i32>} : memref<1x2x16xf32, #tpu.memory_space<vmem>>, vector<1x2x16xf32>,
    return
  }
  func.func @transform_0(%arg0: i32) -> (i32, i32, i32) {
    %c0_i32 = arith.constant 0 : i32
    %c0_i32_0 = arith.constant 0 : i32
    %c0_i32_1 = arith.constant 0 : i32
    return %arg0, %c0_i32, %c0_i32_0 : i32, i32, i32
  }
  func.func @transform_1(%arg0: i32) -> (i32, i32, i32) {
    %c0_i32 = arith.constant 0 : i32
    %c0_i32_0 = arith.constant 0 : i32
    %c0_i32_1 = arith.constant 0 : i32
    return %arg0, %c0_i32, %c0_i32_0 : i32, i32, i32
  }
  func.func @transform_2(%arg0: i32) -> (i32, i32) {
    %c0_i32 = arith.constant 0 : i32
    %c0_i32_0 = arith.constant 0 : i32
    %c0_i32_1 = arith.constant 0 : i32
    return %c0_i32, %c0_i32_0 : i32, i32
  }
  func.func @transform_3(%arg0: i32) -> (i32, i32) {
    %c0_i32 = arith.constant 0 : i32
    %c0_i32_0 = arith.constant 0 : i32
    %c0_i32_1 = arith.constant 0 : i32
    return %c0_i32, %c0_i32_0 : i32, i32
  }
  func.func @transform_4(%arg0: i32) -> (i32, i32, i32) {
    %c0_i32 = arith.constant 0 : i32
    %c0_i32_0 = arith.constant 0 : i32
    %c0_i32_1 = arith.constant 0 : i32
    return %arg0, %c0_i32, %c0_i32_0 : i32, i32, i32
  }
  func.func @transform_5(%arg0: i32) -> (i32, i32, i32) {
    %c0_i32 = arith.constant 0 : i32
    %c0_i32_0 = arith.constant 0 : i32
    %c0_i32_1 = arith.constant 0 : i32
    return %arg0, %c0_i32, %c0_i32_0 : i32, i32, i32
  }
}

</mosaic_0001>

<bundles_post_ra>
// kernel: _lambda_.1
= control target key start
LH: loop header
LB: loop body
LE: loop exit
PB: predicated region body
PF: predicated region fallthrough
CT: control target
= control target key end

     0   :  { %11 = vsyncpa [#allocation3], 0  ;;  %s751_s18 = smov 0   ;;  %s838_s0 = inlined_call_operand.vmem [shape: f32[2,2,256], index: 0, kind: input, shape index: {}]   ;;  %s839_s1 = inlined_call_operand.vmem [shape: f32[2,2,64], index: 1, kind: input, shape index: {}]   ;;  %s840_s2 = inlined_call_operand.hbm [shape: f32[256,64], index: 2, kind: input, shape index: {}]   ;;  %s841_s3 = inlined_call_operand.vmem [shape: f32[64,16], index: 3, kind: input, shape index: {}]   ;;  %s842_s4 = inlined_call_operand.vmem [shape: f32[2,2,64], index: 4, kind: output, shape index: {0}]   ;;  %s843_s5 = inlined_call_operand.vmem [shape: f32[2,2,16], index: 5, kind: output, shape index: {1}]  }
   0x1 LB: > { %s757_s19 = sadd.s32 4294967295, %s714_s18   ;;  %p577_p0 = scmp.ge.s32.totalorder %s714_s18, 1  ;;  %s714_s18 = sphi %s751_s18, %s17_s18  }
   0x2   : > { %p168_p1 = scmp.lt.s32.totalorder %s714_s18, 3  ;;  %s716_s20 = smov [#allocation2]  }
   0x3   : > { %s180_s21 = sshll.u32 %s716_s20, 4  ;;  %p663_p3 = scmp.eq.s32.totalorder %s757_s19, 0  ;;  %s181_s21 = int_to_ptr.vmem [resolvable:$true] %s180_s21 }
   0x4   : > { %p761_p2 = pnand %p577_p0, %p168_p1  ;;  %s689_s23 = scalar_lea.vmem %s181_s21, 4096 }
   0x5   : > { %p690_p7 = scmp.ne.s32.totalorder %s181_s21, %s689_s23  ;;  %p697_p10 = scmp.lt.s32.totalorder %s181_s21, %s181_s21 }
   0x6   : > { %p659_p4 = pneg %p761_p2  ;;  %p698_p11 = scmp.lt.s32.totalorder %s689_s23, %s689_s23 }
   0x8   : > { %p660_p5 = pnand %p663_p3, %p659_p4  ;;  %p699_p12 = por %p698_p11, %p697_p10 }
   0xa   : > { %p680_p6 = pneg %p660_p5 }
   0xc   : > { %p692_p8 = pnand %p690_p7, %p680_p6 }
   0xe   : > { %p693_p9 = pneg %p692_p8 }
  0x10   : > { %p700_p13 = pnand %p699_p12, %p693_p9 }
  0x12   : > { %703 = shalt.err (!%p700_p13)
}
  0x13   : > { %s717_s24 = smov 128   ;;  %s718_s25 = smov 8  }
  0x14   : > { %662 = dma.hbm_to_vmem [thread:$0]  (!%p660_p5), %s840_s2, 4096, %s181_s21, [#allocation3], %s717_s24, %s717_s24, %s718_s25  }
  0x15   : > { %214 = sbr.rel (%p761_p2) target bundleno = 259 (0x103), region = 36 }
  0x1a   : > { %709 = dma.done.wait (%p663_p3), [#allocation3], 4096  }
  0x1b   : > { %711 = vsyncadd (%p663_p3), [#allocation3], 4294963200  ;;  %v719_v0 = vmov 0.0   ;;  %vm720_vm0 = vmmov 0   ;;  %p249_p0 = scmp.lt.s32.totalorder %s757_s19, 1  ;;  %v298_v1 = vld [vmem:[#allocation2 + $0xf8] sm:$0xff] }
  0x1c   : > { %636 = vmatprep.subr.mxu1 %v719_v0  ;;  %652 = vmatprep.mubr.msk.f32.mxu1 %vm720_vm0, %v719_v0  ;;  %v282_v2 = vld [vmem:[#allocation2 + $0x78] sm:$0xff]  ;;  %v297_v3 = vld [vmem:[#allocation2 + $0xf0] sm:$0xff]  ;;  %v296_v5 = vld [vmem:[#allocation2 + $0xe8] sm:$0xff]  ;;  %vm391_vm1 = vcmask 523264   ;;  %vm465_vm2 = vcmask 123904   ;;  %vm380_vm3 = vcmask 517120  }
  0x1d   : > { %592 = vmatprep.subr.mxu0 %v298_v1  ;;  %v281_v4 = vld [vmem:[#allocation2 + $0x70] sm:$0xff]  ;;  %v280_v6 = vld [vmem:[#allocation2 + $0x68] sm:$0xff]  ;;  %s846_s19 = smov (!%p249_p0, %s757_s19), 1  ;;  %v295_v7 = vld [vmem:[#allocation2 + $0xe0] sm:$0xff] }
  0x1e   : > { %593 = vmatpush3.msra.mxu0 %v282_v2  ;;  %v279_v8 = vld [vmem:[#allocation2 + $0x60] sm:$0xff]  ;;  %v294_v9 = vld [vmem:[#allocation2 + $0xd8] sm:$0xff]  ;;  %v389_v12 = vld [vmem:[%s841_s3 + $0x30] sm:$0xff]  ;;  %s591_s7 = sshll.u32 %s846_s19, 2  ;;  %s812_s21 = sshll.u32 %s846_s19, 1 }
  0x1f   : > { %594 = vmatprep.subr.mxu0 %v297_v3  ;;  %v390_v10 = vld [vmem:[%s841_s3 + $0x38] sm:$0xff]  ;;  %v293_v13 = vld [vmem:[#allocation2 + $0xd0] sm:$0xff]  ;;  %v388_v14 = vld [vmem:[%s841_s3 + $0x28] sm:$0xff]  ;;  %s253_s14 = scalar_lea.vmem %s838_s0, %s591_s7  ;;  %s257_s19 = scalar_lea.vmem %s839_s1, %s812_s21 }
  0x20   : > { %595 = vmatpush3.msra.mxu0 %v281_v4  ;;  %v278_v11 = vld [vmem:[#allocation2 + $0x58] sm:$0xff]  ;;  %637 = vmatpush3.msra.mxu1 %v390_v10  ;;  %v277_v15 = vld [vmem:[#allocation2 + $0x50] sm:$0xff]  ;;  %v292_v16 = vld [vmem:[#allocation2 + $0xc8] sm:$0xff]  ;;  %s265_s30 = scalar_lea.vmem %s843_s5, %s812_s21  ;;  %s261_s8 = scalar_lea.vmem %s842_s4, %s812_s21 }
  0x21   : > { %596 = vmatprep.subr.mxu0 %v296_v5  ;;  %638 = vmatprep.subr.mxu1 %v719_v0  ;;  %v387_v17 = vld [vmem:[%s841_s3 + $0x20] sm:$0xff]  ;;  %v276_v18 = vld [vmem:[#allocation2 + $0x48] sm:$0xff]  ;;  %v386_v20 = vld [vmem:[%s841_s3 + $0x18] sm:$0xff] }
  0x22   : > { %597 = vmatpush3.msra.mxu0 %v280_v6  ;;  %639 = vmatpush3.msra.mxu1 %v389_v12  ;;  %v291_v19 = vld [vmem:[#allocation2 + $0xc0] sm:$0xff]  ;;  %v290_v23 = vld [vmem:[#allocation2 + $0xb8] sm:$0xff]  ;;  %v385_v24 = vld [vmem:[%s841_s3 + $0x10] sm:$0xff] }
  0x23   : > { %598 = vmatprep.subr.mxu0 %v295_v7  ;;  %640 = vmatprep.subr.mxu1 %v719_v0  ;;  %v275_v21 = vld [vmem:[#allocation2 + $0x40] sm:$0xff]  ;;  %v274_v25 = vld [vmem:[#allocation2 + $0x38] sm:$0xff]  ;;  %v289_v26 = vld [vmem:[#allocation2 + $0xb0] sm:$0xff] }
  0x24   : > { %599 = vmatpush3.msra.mxu0 %v279_v8  ;;  %641 = vmatpush3.msra.mxu1 %v388_v14  ;;  %v587_v22 = vld.sshfl [vmem:[%s253_s14] sm:$0x33 pattern:$0x76325410]  ;;  %v384_v27 = vld [vmem:[%s841_s3 + $0x8] sm:$0xff]  ;;  %v273_v29 = vld [vmem:[#allocation2 + $0x30] sm:$0xff] }
  0x25   : > { %600 = vmatprep.subr.mxu0 %v294_v9  ;;  %642 = vmatprep.subr.mxu1 %v719_v0  ;;  %v307_v28 = vcombine.high %v587_v22, %v587_v22  ;;  %v288_v30 = vld [vmem:[#allocation2 + $0xa8] sm:$0xff]  ;;  %v383_v32 = vld [vmem:[%s841_s3] sm:$0xff]  ;;  %v286_v36 = vld [vmem:[#allocation2 + $0x98] sm:$0xff] }
  0x26   : > { %601 = vmatpush3.msra.mxu0 %v278_v11  ;;  %643 = vmatpush3.msra.mxu1 %v387_v17  ;;  %v272_v31 = vld [vmem:[#allocation2 + $0x28] sm:$0xff]  ;;  %v287_v33 = vld [vmem:[#allocation2 + $0xa0] sm:$0xff]  ;;  %v270_v37 = vld [vmem:[#allocation2 + $0x18] sm:$0xff] }
  0x27   : > { %602 = vmatprep.subr.mxu0 %v293_v13  ;;  %644 = vmatprep.subr.mxu1 %v719_v0  ;;  %v382_v34 = vld [vmem:[%s257_s19] sm:$0x3]  ;;  %v285_v38 = vld [vmem:[#allocation2 + $0x90] sm:$0xff]  ;;  %v284_v40 = vld [vmem:[#allocation2 + $0x88] sm:$0xff] }
  0x28   : > { %603 = vmatpush3.msra.mxu0 %v277_v15  ;;  %645 = vmatpush3.msra.mxu1 %v386_v20  ;;  %v271_v35 = vld [vmem:[#allocation2 + $0x20] sm:$0xff]  ;;  %v269_v39 = vld [vmem:[#allocation2 + $0x10] sm:$0xff]  ;;  %v268_v41 = vld [vmem:[#allocation2 + $0x8] sm:$0xff] }
  0x29   : > { %604 = vmatprep.subr.mxu0 %v292_v16  ;;  %646 = vmatprep.subr.mxu1 %v719_v0  ;;  %v283_v42 = vld [vmem:[#allocation2 + $0x80] sm:$0xff] }
  0x2a   : > { %605 = vmatpush3.msra.mxu0 %v276_v18  ;;  %647 = vmatpush3.msra.mxu1 %v385_v24  ;;  %v267_v43 = vld [vmem:[#allocation2] sm:$0xff] }
  0x2b   : > { %606 = vmatprep.subr.mxu0 %v291_v19  ;;  %648 = vmatprep.subr.mxu1 %v719_v0 }
  0x2c   : > { %607 = vmatpush3.msra.mxu0 %v275_v21  ;;  %649 = vmatpush3.msra.mxu1 %v384_v27 }
  0x2d   : > { %608 = vmatprep.subr.mxu0 %v290_v23  ;;  %374 = vmatprep.mubr.f32.mxu0 %v307_v28 }
  0x2e   : > { %609 = vmatpush3.msra.mxu0 %v274_v25  ;;  %650 = vmatprep.subr.mxu1 %v719_v0 }
  0x2f   : > { %610 = vmatprep.subr.mxu0 %v289_v26  ;;  %651 = vmatpush3.msra.mxu1 %v383_v32 }
  0x30   : > { %611 = vmatpush3.msra.mxu0 %v273_v29  ;;  %653 = vmatmul.mubr.msk.f32.vlgmr.msra.gmra.mxu1 %vm391_vm1, %v382_v34 }
  0x31   : > { %612 = vmatprep.subr.mxu0 %v288_v30 }
  0x32   : > { %613 = vmatpush3.msra.mxu0 %v272_v31 }
  0x33   : > { %614 = vmatprep.subr.mxu0 %v287_v33 }
  0x34   : > { %615 = vmatpush3.msra.mxu0 %v271_v35 }
  0x35   : > { %616 = vmatprep.subr.mxu0 %v286_v36 }
  0x36   : > { %617 = vmatpush3.msra.mxu0 %v270_v37 }
  0x37   : > { %618 = vmatprep.subr.mxu0 %v285_v38 }
  0x38   : > { %619 = vmatpush3.msra.mxu0 %v269_v39 }
  0x39   : > { %620 = vmatprep.subr.mxu0 %v284_v40 }
  0x3a   : > { %621 = vmatpush3.msra.mxu0 %v268_v41 }
  0x3b   : > { %622 = vmatprep.subr.mxu0 %v283_v42 }
  0x3c   : > { %623 = vmatpush3.msra.mxu0 %v267_v43 }
  0x3d   : > { %375 = vmatmul.mubr.f32.vlgmr.msra.gmra.mxu0 %v587_v22 }
  0xf0   : > { %v461_v44 = vpop.f32.mrf.mxu1 }
  0xf1   : > { %466 = vst.msk [vmem:[%s265_s30] sm:$0x3] %vm465_vm2, %v461_v44 }
  0xf2   : > { %v654_v45 = vpop.f32.mrf.mxu1 }
  0xfd   : > { %v624_v46 = vpop.f32.mrf.mxu0 }
  0xff   : > { %v625_v47 = vpop.f32.mrf.mxu0 }
 0x100   : > { %v626_v48 = vadd.f32 %v625_v47, %v624_v46 }
 0x102   : > { %381 = vst.msk [vmem:[%s261_s8] sm:$0x3] %vm380_vm3, %v626_v48 }
 0x103 PF: > { %s17_s18 = sadd.s32 1, %s714_s18  }
 0x104   : > { %p14_p1 = scmp.ge.s32.totalorder %s17_s18, 4  }
 0x106   :  { %16 = sbr.rel (!%p14_p1) target bundleno = 1 (0x1), region = 86 }
 0x10b   :  { %500 = vsyncpa [#allocation3], 1 }
 0x10c   :  { %502 = vsyncpa [#allocation3 + $0x1], 1 }

</bundles_post_ra>
